<compile_context>
chip_gen: v6e
topology: v6e:2x2x1
jax: 0.10.0
libtpu: 0.0.40
codegen_flags: <defaults>
</compile_context>

<pallas_src>
import math

import jax
import jax.numpy as jnp
from jax.experimental import pallas as pl
from jax.experimental.pallas import tpu as pltpu


_SUBLANE = 8
# v7x-safe resident-table budget (64 MiB physical VMEM on v7x; leave headroom
# for the double-buffered output tiles and the one-hot temporary).
_VMEM_TABLE_BUDGET = 24 * (1 << 20)
# Most conservative scoped-VMEM default across generations (v5e: 16 MiB).
_DEFAULT_SCOPED_VMEM = 16 * (1 << 20)


def _round_up(x: int, m: int) -> int:
    return ((x + m - 1) // m) * m


def _embedding_onehot_kernel(ids_ref, table_ref, out_ref):
    """One grid step: gather T rows of the VMEM-resident embedding table.

    ids_ref:   (T, 1)            int32 VMEM tile — token ids for this tile.
    table_ref: (num_nodes, h_dim) VMEM        — full table, resident across steps.
    out_ref:   (T, h_dim)         VMEM tile   — gathered rows (dense store).
    """
    num_nodes = table_ref.shape[0]
    t = ids_ref.shape[0]

    # Clamp ids (matches jnp.take's TPU clamp semantics, guards bad inputs).
    ids = jnp.clip(ids_ref[...], 0, num_nodes - 1)                      # (T, 1)

    # One-hot selector on the VPU, gather on the MXU.
    iota = jax.lax.broadcasted_iota(jnp.int32, (t, num_nodes), 1)       # (T, V)
    onehot = (iota == ids).astype(jnp.float32)                          # 0/1

    out = jnp.dot(onehot, table_ref[...].astype(jnp.float32),
                  preferred_element_type=jnp.float32)                   # (T, H)
    out_ref[...] = out.astype(out_ref.dtype)


def embedding_lookup(table: jax.Array, ids: jax.Array, *,
                     token_tile: int = 128) -> jax.Array:
    """Gather rows of `table` (num_nodes, h_dim) at integer positions `ids` (seq,)."""
    assert table.ndim == 2 and ids.ndim == 1
    num_nodes, h_dim = table.shape
    seq = ids.shape[0]
    ids = ids.astype(jnp.int32)

    itemsize = jnp.dtype(table.dtype).itemsize
    table_bytes = num_nodes * h_dim * itemsize
    if table_bytes > _VMEM_TABLE_BUDGET:
        # TODO(synk): large-vocabulary path (manual multi-buffered per-row DMA
        # gather with memory_space=pl.ANY) not implemented; this kernel uses the
        # VMEM-resident-table + one-hot MXU path only.
        raise NotImplementedError(
            f"embedding table of {table_bytes} bytes exceeds the "
            f"{_VMEM_TABLE_BUDGET} byte resident-table VMEM budget")

    # Token tile: multiple of 8 sublanes, up to `token_tile`.
    t_tile = min(token_tile, _round_up(seq, _SUBLANE))
    t_tile = max(_SUBLANE, _round_up(t_tile, _SUBLANE))
    padded_seq = _round_up(seq, t_tile)

    # Ids as a (padded_seq, 1) column so the (T, 1) block is already
    # sublane-oriented in-kernel (no 1-D->2-D relayout inside the kernel).
    ids_col = jnp.zeros((padded_seq, 1), jnp.int32).at[:seq, 0].set(ids)

    # VMEM budget accounting: resident table + double-buffered ids/out tiles
    # + one-hot temporary.  Only raise the scoped limit when actually needed.
    out_tile_bytes = t_tile * h_dim * itemsize
    onehot_bytes = t_tile * num_nodes * 4
    needed = table_bytes + 2 * out_tile_bytes + 2 * (t_tile * 4) \
        + onehot_bytes + (1 << 20)
    compiler_kwargs = dict(dimension_semantics=("parallel",))
    if needed > _DEFAULT_SCOPED_VMEM:
        compiler_kwargs["vmem_limit_bytes"] = int(
            min(2 * needed, 48 * (1 << 20)))   # stay v7x-safe (64 MiB physical)

    grid_spec = pltpu.PrefetchScalarGridSpec(
        num_scalar_prefetch=0,
        grid=(padded_seq // t_tile,),
        in_specs=[
            # Per-step tile of token ids.
            pl.BlockSpec((t_tile, 1), lambda i: (i, 0)),
            # Whole table, constant index_map => DMA'd once, resident in VMEM.
            pl.BlockSpec((num_nodes, h_dim), lambda i: (0, 0)),
        ],
        out_specs=pl.BlockSpec((t_tile, h_dim), lambda i: (i, 0)),
    )

    out = pl.pallas_call(
        _embedding_onehot_kernel,
        out_shape=jax.ShapeDtypeStruct((padded_seq, h_dim), table.dtype),
        grid_spec=grid_spec,
        compiler_params=pltpu.CompilerParams(**compiler_kwargs),
    )(ids_col, table)

    return out[:seq]


def init_embedding_weight(key, num_nodes: int, h_dim: int) -> jax.Array:
    """Deterministic xavier_normal_ init of the (num_nodes, h_dim) embedding table."""
    # xavier_normal_: std = gain * sqrt(2 / (fan_in + fan_out)), gain = 1.0
    std = math.sqrt(2.0 / float(num_nodes + h_dim))
    return jax.random.normal(key, (num_nodes, h_dim), dtype=jnp.float32) * std


if __name__ == "__main__":
    key = jax.random.PRNGKey(0)
    k_w, k_ids = jax.random.split(key)

    # Small shapes consistent with the module: num_nodes x h_dim embedding,
    # looked up with a short flat sequence of node ids.
    num_nodes = 64
    h_dim = 128
    seq = 8

    table = init_embedding_weight(k_w, num_nodes, h_dim)
    ids = jax.random.randint(k_ids, (seq,), minval=0, maxval=num_nodes,
                             dtype=jnp.int32)
    # include the padding index 0 explicitly to exercise that row
    ids = ids.at[0].set(0)

    out = embedding_lookup(table, ids)
    out = jax.block_until_ready(out)

    # Correctness check against plain-JAX gather.
    ref = jnp.take(table, ids, axis=0)
    assert out.shape == (seq, h_dim), out.shape
    assert out.dtype == table.dtype, out.dtype
    if not bool(jnp.allclose(out, ref, atol=1e-6, rtol=1e-6)):
        raise AssertionError("Pallas embedding lookup mismatch vs reference")

    print("KERNEL_OK")
</pallas_src>

<mosaic_0001>
module attributes {stable_mosaic.version = 11 : i64} {
  func.func @_embedding_onehot_kernel(%arg0: i32, %arg1: memref<8x1xi32, #tpu.memory_space<vmem>>, %arg2: memref<64x128xf32, #tpu.memory_space<vmem>>, %arg3: memref<8x128xf32, #tpu.memory_space<vmem>>) attributes {dimension_semantics = [#tpu.dimension_semantics<parallel>], iteration_bounds = array<i64: 1>, scalar_prefetch = 0 : i64, scratch_operands = 0 : i64, tpu.core_type = #tpu.core_type<tc>, window_params = [{transform_indices = @transform_0, window_bounds = array<i64: 8, 1>}, {pipeline_mode = #tpu.pipeline_mode<synchronous>, transform_indices = @transform_1, window_bounds = array<i64: 64, 128>}, {transform_indices = @transform_2, window_bounds = array<i64: 8, 128>}]} {
    %c0 = arith.constant 0 : index
    %c0_0 = arith.constant 0 : index
    %0 = vector.load %arg1[%c0, %c0_0] : memref<8x1xi32, #tpu.memory_space<vmem>>, vector<8x1xi32>
    %c0_i32 = arith.constant 0 : i32
    %c63_i32 = arith.constant 63 : i32
    %1 = vector.broadcast %c0_i32 : i32 to vector<8x1xi32>
    %2 = arith.maxsi %1, %0 : vector<8x1xi32>
    %3 = vector.broadcast %c63_i32 : i32 to vector<8x1xi32>
    %4 = arith.minsi %3, %2 : vector<8x1xi32>
    %5 = tpu.iota {dimensions = array<i32: 1>} : vector<8x64xi32>
    %6 = vector.broadcast %4 : vector<8x1xi32> to vector<8x64xi32>
    %7 = arith.cmpi eq, %5, %6 : vector<8x64xi32>
    %8 = arith.extui %7 : vector<8x64xi1> to vector<8x64xi32>
    %9 = arith.sitofp %8 : vector<8x64xi32> to vector<8x64xf32>
    %c0_1 = arith.constant 0 : index
    %c0_2 = arith.constant 0 : index
    %10 = vector.load %arg2[%c0_1, %c0_2] : memref<64x128xf32, #tpu.memory_space<vmem>>, vector<64x128xf32>
    %cst = arith.constant dense<0.000000e+00> : vector<8x128xf32>
    %11 = tpu.matmul %9, %10, %cst {dimension_numbers = #tpu.dot_dimension_numbers<[1], [0], [0], [1], [0, 0, 1, 1], [], []>} : vector<8x64xf32>, vector<64x128xf32>, vector<8x128xf32> -> vector<8x128xf32>
    %c0_3 = arith.constant 0 : index
    %c0_4 = arith.constant 0 : index
    %12 = vector.load %arg3[%c0_3, %c0_4] : memref<8x128xf32, #tpu.memory_space<vmem>>, vector<8x128xf32>
    tpu.vector_store %arg3[%c0_3, %c0_4], %11 {strides = array<i32>} : memref<8x128xf32, #tpu.memory_space<vmem>>, vector<8x128xf32>,
    return
  }
  func.func @transform_0(%arg0: i32) -> (i32, i32) {
    %c0_i32 = arith.constant 0 : i32
    %c0_i32_0 = arith.constant 0 : i32
    return %arg0, %c0_i32 : i32, i32
  }
  func.func @transform_1(%arg0: i32) -> (i32, i32) {
    %c0_i32 = arith.constant 0 : i32
    %c0_i32_0 = arith.constant 0 : i32
    %c0_i32_1 = arith.constant 0 : i32
    return %c0_i32, %c0_i32_0 : i32, i32
  }
  func.func @transform_2(%arg0: i32) -> (i32, i32) {
    %c0_i32 = arith.constant 0 : i32
    %c0_i32_0 = arith.constant 0 : i32
    return %arg0, %c0_i32 : i32, i32
  }
}

</mosaic_0001>

<bundles_post_ra>
// kernel: tpu_custom_call.1
= control target key start
LH: loop header
LB: loop body
LE: loop exit
PB: predicated region body
PF: predicated region fallthrough
CT: control target
= control target key end

     0   :  { %7 = vsyncpa [#allocation3], 0  ;;  %s250_s0 = inlined_call_operand.vmem [shape: s32[8,1], index: 0, kind: input, shape index: {}]   ;;  %s251_s1 = inlined_call_operand.hbm [shape: f32[64,128], index: 1, kind: input, shape index: {}]   ;;  %s252_s2 = inlined_call_operand.hbm [shape: f32[8,128], index: 2, kind: output, shape index: {}]  }
   0x1   :  { %8 = vsyncpa [#allocation4], 0  ;;  %s219_s9 = smov [#allocation2]  }
   0x2   :  { %s16_s10 = sshll.u32 %s219_s9, 4  ;;  %s17_s10 = int_to_ptr.vmem [resolvable:$true] %s16_s10 }
   0x3   :  { %s183_s11 = scalar_lea.vmem %s17_s10, 1024  ;;  %p188_p1 = scmp.lt.s32.totalorder %s17_s10, %s17_s10 }
   0x4   :  { %p184_p0 = scmp.ne.s32.totalorder %s17_s10, %s183_s11  ;;  %p189_p2 = scmp.lt.s32.totalorder %s183_s11, %s183_s11 }
   0x6   :  { %p190_p3 = por %p189_p2, %p188_p1 }
   0x8   :  { %p191_p4 = pnand %p190_p3, %p184_p0 }
   0xa   :  { %194 = shalt.err (!%p191_p4)
}
   0xb   :  { %s220_s12 = smov 128   ;;  %s221_s13 = smov 8  }
   0xc   :  { %22 = dma.hbm_to_vmem [thread:$0]  %s251_s1, 1024, %s17_s10, [#allocation3], %s220_s12, %s220_s12, %s221_s13  }
   0xd   :  { %215 = dma.done.wait [#allocation3], 1024  }
   0xe   :  { %216 = vsyncadd [#allocation3], 4294966272  ;;  %v222_v0 = vmov 0   ;;  %v223_v1 = vmov 0.0   ;;  %v26_v2 = vld [vmem:[%s250_s0] sm:$0xff]  ;;  %v46_v3 = vld [vmem:[#allocation2 + $0x38] sm:$0xff]  ;;  %v31_v13 = vlaneseq }
   0xf   :  { %174 = vset.pattern.permute.xlu0 %v222_v0  ;;  %148 = vmatprep.subr.mxu0 %v223_v1  ;;  %v45_v4 = vld [vmem:[#allocation2 + $0x30] sm:$0xff]  ;;  %vm27_vm0 = vcmp.gt.s32.totalorder %v26_v2, 0  ;;  %v44_v6 = vld [vmem:[#allocation2 + $0x28] sm:$0xff]  ;;  %vm224_vm1 = vmmov 0   ;;  %v43_v8 = vld [vmem:[#allocation2 + $0x20] sm:$0xff]  ;;  %vm47_vm3 = vcmask 523264  }
  0x10   :  { %149 = vmatpush3.msra.mxu0 %v46_v3  ;;  %v28_v5 = vsel %vm27_vm0, %v26_v2, 0  ;;  %164 = vmatprep.mubr.msk.f32.mxu0 %vm224_vm1, %v223_v1  ;;  %v42_v9 = vld [vmem:[#allocation2 + $0x18] sm:$0xff]  ;;  %v41_v10 = vld [vmem:[#allocation2 + $0x10] sm:$0xff]  ;;  %v40_v11 = vld [vmem:[#allocation2 + $0x8] sm:$0xff]  ;;  %v32_v14 = vand.u32 127, %v31_v13  ;;  %s225_s0 = smov [#allocation5]  }
  0x11   :  { %150 = vmatprep.subr.mxu0 %v223_v1  ;;  %vm29_vm2 = vcmp.lt.s32.totalorder %v28_v5, 63  ;;  %v39_v12 = vld [vmem:[#allocation2] sm:$0xff]  ;;  %s128_s1 = sshll.u32 %s225_s0, 4  ;;  %s129_s1 = int_to_ptr.vmem [resolvable:$true] %s128_s1 }
  0x12   :  { %151 = vmatpush3.msra.mxu0 %v45_v4  ;;  %v30_v7 = vsel %vm29_vm2, %v28_v5, 63  ;;  %s195_s18 = scalar_lea.vmem %s129_s1, 128  ;;  %p200_p6 = scmp.lt.s32.totalorder %s129_s1, %s129_s1 }
  0x13   :  { %152 = vmatprep.subr.mxu0 %v223_v1  ;;  %34 = vperm.xlu0 %174, %v30_v7   ;;  %p196_p5 = scmp.ne.s32.totalorder %s129_s1, %s195_s18  ;;  %p201_p7 = scmp.lt.s32.totalorder %s195_s18, %s195_s18 }
  0x14   :  { %153 = vmatpush3.msra.mxu0 %v44_v6 }
  0x15   :  { %154 = vmatprep.subr.mxu0 %v223_v1  ;;  %p202_p8 = por %p201_p7, %p200_p6 }
  0x16   :  { %155 = vmatpush3.msra.mxu0 %v43_v8 }
  0x17   :  { %156 = vmatprep.subr.mxu0 %v223_v1  ;;  %p203_p9 = pnand %p202_p8, %p196_p5 }
  0x18   :  { %157 = vmatpush3.msra.mxu0 %v42_v9 }
  0x19   :  { %158 = vmatprep.subr.mxu0 %v223_v1 }
  0x1a   :  { %159 = vmatpush3.msra.mxu0 %v41_v10 }
  0x1b   :  { %160 = vmatprep.subr.mxu0 %v223_v1 }
  0x1c   :  { %161 = vmatpush3.msra.mxu0 %v40_v11 }
  0x1d   :  { %162 = vmatprep.subr.mxu0 %v223_v1 }
  0x1e   :  { %163 = vmatpush3.msra.mxu0 %v39_v12 }
  0x8e   :  { %v35_v15 = vpop.permute.xlu0 %34 }
  0x8f   :  { %vm36_vm4 = vcmp.eq.s32.totalorder %v32_v14, %v35_v15 }
  0x90   :  { %v137_v16 = vsel %vm36_vm4, 1.0, %v223_v1 }
  0x91   :  { %165 = vmatmul.mubr.msk.f32.vlgmr.msra.gmra.mxu0 %vm47_vm3, %v137_v16 }
 0x151   :  { %v117_v17 = vpop.f32.mrf.mxu0 }
 0x152   :  { %121 = vst [vmem:[#allocation5] sm:$0xff] %v117_v17 }
 0x153   :  { %v166_v18 = vpop.f32.mrf.mxu0 }
 0x154   :  { %206 = shalt.err (!%p203_p9)
}
 0x155   :  { %131 = dma.vmem_to_hbm [thread:$0]  %s129_s1, 128, %s252_s2, [#allocation4]  }
 0x156   :  { %217 = dma.done.wait [#allocation4], 128  }
 0x157   :  { %218 = vsyncadd [#allocation4], 4294967168 }
 0x158   :  { %135 = vsyncpa [#allocation3], 1 }
 0x159   :  { %136 = vsyncpa [#allocation4], 1 }

</bundles_post_ra>
